<compile_context>
chip_gen: v7x
topology: tpu7x:2x2x1
jax: 0.10.0
libtpu: 0.0.40
codegen_flags: <defaults>
</compile_context>

<pallas_src>
import functools

import jax
import jax.numpy as jnp
from jax.experimental import pallas as pl
from jax.experimental.pallas import tpu as pltpu


def _center_loss_kernel(labels_ref,    # (N,) int32 in SMEM (scalar prefetch)
                        emb_ref,       # (tile_m, D) VMEM block of embeddings
                        centers_hbm,   # (C, D) ref left in HBM (pl.ANY)
                        out_ref,       # (1, 8, 128) VMEM block: per-tile partial
                        cbuf,          # (tile_m, D) VMEM scratch: gathered centers
                        sem,           # (tile_m,) DMA semaphores
                        *, metric, tile_m):
    t = pl.program_id(0)
    row0 = t * tile_m

    # True row gather: one small DMA per row, HBM address driven by the SMEM label.
    @pl.loop(0, tile_m)
    def _(r):
        lbl = labels_ref[row0 + r]
        pltpu.make_async_copy(centers_hbm.at[pl.ds(lbl, 1), :],
                              cbuf.at[pl.ds(r, 1), :],
                              sem.at[r]).start()

    @pl.loop(0, tile_m)
    def _(r):
        pltpu.make_async_copy(centers_hbm.at[pl.ds(0, 1), :],
                              cbuf.at[pl.ds(r, 1), :],
                              sem.at[r]).wait()

    diff = emb_ref[...].astype(jnp.float32) - cbuf[...].astype(jnp.float32)
    if metric == 'L1':
        per_row = jnp.sum(jnp.abs(diff), axis=-1, keepdims=True)   # lane reduce
    else:  # 'L2'
        per_row = jnp.sum(diff * diff, axis=-1, keepdims=True)
    partial = jnp.sum(per_row)                                     # sublane reduce

    # Lane-dense, unmasked store of the per-tile partial (parallel-safe).
    out_ref[...] = jnp.full((1, 8, 128), partial, dtype=jnp.float32)


def _pick_tile_m(n):
    """Largest convenient row tile that divides n (8-aligned when tiled)."""
    for tm in (512, 256, 128, 64, 32, 16, 8):
        if n % tm == 0:
            return tm
    return n  # small / ragged batch: single full-extent tile


@functools.partial(jax.jit, static_argnames=("metric",))
def center_loss(embeddings, labels, centers, metric='L2'):
    """Pallas implementation of CenterLoss.forward.

    embeddings: (N, D) float array
    labels:     (N,)   integer array
    centers:    (num_classes, D) float array (the nn.Parameter)
    returns:    scalar float32 loss
    """
    if metric not in ('L1', 'L2'):
        raise TypeError('metric must be: "L1" or "L2"')

    n, d = embeddings.shape
    num_classes = centers.shape[0]

    # PyTorch would raise on out-of-range labels; clamping keeps the DMA
    # address in range instead of silently producing a zero row.
    labels_i32 = jnp.clip(labels.astype(jnp.int32), 0, num_classes - 1)

    tile_m = _pick_tile_m(n)
    num_tiles = n // tile_m

    kernel = functools.partial(_center_loss_kernel, metric=metric,
                               tile_m=tile_m)

    grid_spec = pltpu.PrefetchScalarGridSpec(
        num_scalar_prefetch=1,            # labels -> SMEM
        grid=(num_tiles,),
        in_specs=[
            pl.BlockSpec((tile_m, d), lambda t, labels: (t, 0)),  # embeddings
            pl.BlockSpec(memory_space=pl.ANY),                    # centers in HBM
        ],
        out_specs=pl.BlockSpec((1, 8, 128), lambda t, labels: (t, 0, 0)),
        scratch_shapes=[
            pltpu.VMEM((tile_m, d), centers.dtype),   # gathered center rows
            pltpu.SemaphoreType.DMA((tile_m,)),       # one sem per gathered row
        ],
    )

    partials = pl.pallas_call(
        kernel,
        out_shape=jax.ShapeDtypeStruct((num_tiles, 8, 128), jnp.float32),
        grid_spec=grid_spec,
        compiler_params=pltpu.CompilerParams(
            dimension_semantics=("parallel",)),
    )(labels_i32, embeddings, centers)

    # Tiny final reduce + normalization outside the kernel (keeps grid parallel).
    return jnp.sum(partials[:, 0, 0]) / jnp.float32(n)


def center_loss_ref(embeddings, labels, centers, metric='L2'):
    """Pure-JAX reference matching the PyTorch module semantics."""
    centers_batch = centers[labels.astype(jnp.int32)]
    diff = embeddings - centers_batch
    if metric == 'L1':
        total = jnp.sum(jnp.abs(diff))
    else:
        total = jnp.sum(diff ** 2)
    return total / embeddings.shape[0]


if __name__ == "__main__":
    # Small, deterministic setup consistent with the module:
    #   latent_dim=32, num_classes=10, batch=8
    latent_dim = 32
    num_classes = 10
    batch = 8

    key = jax.random.PRNGKey(0)
    k_centers, k_emb, k_lbl = jax.random.split(key, 3)

    centers = jax.random.normal(k_centers, (num_classes, latent_dim),
                                dtype=jnp.float32)
    embeddings = jax.random.normal(k_emb, (batch, latent_dim),
                                   dtype=jnp.float32)
    labels = jax.random.randint(k_lbl, (batch,), 0, num_classes,
                                dtype=jnp.int32)

    for metric in ("L2", "L1"):
        loss = center_loss(embeddings, labels, centers, metric=metric)
        loss = jax.block_until_ready(loss)
        ref = center_loss_ref(embeddings, labels, centers, metric=metric)
        assert jnp.allclose(loss, ref, rtol=1e-5, atol=1e-5), (metric, loss, ref)

    # TODO(synk): update_centers (in-place EMA of center rows) is training-time
    # parameter mutation, not part of forward; not implemented as a kernel here.

    print("KERNEL_OK")
</pallas_src>

<mosaic_0001>
module attributes {stable_mosaic.version = 11 : i64} {
  func.func @_center_loss_kernel(%arg0: i32, %arg1: memref<8xi32, #tpu.memory_space<smem>>, %arg2: memref<8x32xf32, #tpu.memory_space<vmem>>, %arg3: memref<10x32xf32, #tpu.memory_space<any>>, %arg4: memref<1x8x128xf32, #tpu.memory_space<vmem>>, %arg5: memref<8x32xf32, #tpu.memory_space<vmem>>, %arg6: memref<8x!tpu.dma_semaphore, #tpu.memory_space<semaphore_mem>>) attributes {dimension_semantics = [#tpu.dimension_semantics<parallel>], iteration_bounds = array<i64: 1>, scalar_prefetch = 1 : i64, scratch_operands = 2 : i64, tpu.core_type = #tpu.core_type<tc>, window_params = [{transform_indices = @transform_0, window_bounds = array<i64: 8, 32>}, {}, {transform_indices = @transform_2, window_bounds = array<i64: 1, 8, 128>}]} {
    %c8_i32 = arith.constant 8 : i32
    %0 = arith.muli %arg0, %c8_i32 : i32
    %c0_i32 = arith.constant 0 : i32
    %c8_i32_0 = arith.constant 8 : i32
    %1 = arith.addi %c0_i32, %c8_i32_0 : i32
    %c1_i32 = arith.constant 1 : i32
    scf.for %arg7 = %c0_i32 to %1 step %c1_i32  : i32 {
      %c1_i32_13 = arith.constant 1 : i32
      %15 = arith.muli %arg7, %c1_i32_13 : i32
      %c0_i32_14 = arith.constant 0 : i32
      %16 = arith.addi %c0_i32_14, %15 : i32
      %17 = arith.addi %0, %16 : i32
      %18 = arith.index_cast %17 : i32 to index
      %19 = memref.load %arg1[%18] : memref<8xi32, #tpu.memory_space<smem>>
      %c0_i32_15 = arith.constant 0 : i32
      %20 = tpu.memref_slice %arg3[%19, %c0_i32_15] : memref<10x32xf32, #tpu.memory_space<any>> -> memref<1x32xf32, #tpu.memory_space<any>>
      %c0_i32_16 = arith.constant 0 : i32
      %21 = tpu.memref_slice %arg5[%16, %c0_i32_16] : memref<8x32xf32, #tpu.memory_space<vmem>> -> memref<1x32xf32, #tpu.memory_space<vmem>>
      %22 = tpu.memref_slice %arg6[%16] : memref<8x!tpu.dma_semaphore, #tpu.memory_space<semaphore_mem>> -> memref<1x!tpu.dma_semaphore, #tpu.memory_space<semaphore_mem>>
      %23 = tpu.memref_squeeze %22 : memref<1x!tpu.dma_semaphore, #tpu.memory_space<semaphore_mem>> -> memref<!tpu.dma_semaphore, #tpu.memory_space<semaphore_mem>>
      tpu.enqueue_dma source(%20 : memref<1x32xf32, #tpu.memory_space<any>>) target(%21 : memref<1x32xf32, #tpu.memory_space<vmem>>) target_semaphore(%23 : memref<!tpu.dma_semaphore, #tpu.memory_space<semaphore_mem>>)
    }
    %c8_i32_1 = arith.constant 8 : i32
    %c0_i32_2 = arith.constant 0 : i32
    %c8_i32_3 = arith.constant 8 : i32
    %2 = arith.addi %c0_i32_2, %c8_i32_3 : i32
    %c1_i32_4 = arith.constant 1 : i32
    scf.for %arg7 = %c0_i32_2 to %2 step %c1_i32_4  : i32 {
      %c1_i32_13 = arith.constant 1 : i32
      %15 = arith.muli %arg7, %c1_i32_13 : i32
      %c0_i32_14 = arith.constant 0 : i32
      %16 = arith.addi %c0_i32_14, %15 : i32
      %c0_i32_15 = arith.constant 0 : i32
      %c0_i32_16 = arith.constant 0 : i32
      %17 = tpu.memref_slice %arg3[%c0_i32_15, %c0_i32_16] : memref<10x32xf32, #tpu.memory_space<any>> -> memref<1x32xf32, #tpu.memory_space<any>>
      %c0_i32_17 = arith.constant 0 : i32
      %18 = tpu.memref_slice %arg5[%16, %c0_i32_17] : memref<8x32xf32, #tpu.memory_space<vmem>> -> memref<1x32xf32, #tpu.memory_space<vmem>>
      %19 = tpu.memref_slice %arg6[%16] : memref<8x!tpu.dma_semaphore, #tpu.memory_space<semaphore_mem>> -> memref<1x!tpu.dma_semaphore, #tpu.memory_space<semaphore_mem>>
      %20 = tpu.memref_squeeze %19 : memref<1x!tpu.dma_semaphore, #tpu.memory_space<semaphore_mem>> -> memref<!tpu.dma_semaphore, #tpu.memory_space<semaphore_mem>>
      tpu.wait_dma2 semaphore(%20 : memref<!tpu.dma_semaphore, #tpu.memory_space<semaphore_mem>>) src(%17 : memref<1x32xf32, #tpu.memory_space<any>>) dst(%18 : memref<1x32xf32, #tpu.memory_space<vmem>>)
    }
    %c8_i32_5 = arith.constant 8 : i32
    %c0 = arith.constant 0 : index
    %c0_6 = arith.constant 0 : index
    %3 = vector.load %arg2[%c0, %c0_6] : memref<8x32xf32, #tpu.memory_space<vmem>>, vector<8x32xf32>
    %c0_7 = arith.constant 0 : index
    %c0_8 = arith.constant 0 : index
    %4 = vector.load %arg5[%c0_7, %c0_8] : memref<8x32xf32, #tpu.memory_space<vmem>>, vector<8x32xf32>
    %5 = arith.subf %3, %4 : vector<8x32xf32>
    %6 = arith.mulf %5, %5 : vector<8x32xf32>
    %cst = arith.constant dense<0.000000e+00> : vector<8xf32>
    %7 = vector.multi_reduction <add>, %6, %cst [1] : vector<8x32xf32> to vector<8xf32>
    %8 = vector.shape_cast %7 : vector<8xf32> to vector<8x1xf32>
    %9 = vector.shape_cast %8 : vector<8x1xf32> to vector<1x8x1xf32>
    %cst_9 = arith.constant dense<0.000000e+00> : vector<1xf32>
    %10 = vector.multi_reduction <add>, %9, %cst_9 [1, 2] : vector<1x8x1xf32> to vector<1xf32>
    %11 = vector.shape_cast %10 : vector<1xf32> to vector<1x1x1xf32>
    %12 = vector.extract %11[0, 0, 0] : f32 from vector<1x1x1xf32>
    %13 = vector.broadcast %12 : f32 to vector<1x8x128xf32>
    %c0_10 = arith.constant 0 : index
    %c0_11 = arith.constant 0 : index
    %c0_12 = arith.constant 0 : index
    %14 = vector.load %arg4[%c0_10, %c0_11, %c0_12] : memref<1x8x128xf32, #tpu.memory_space<vmem>>, vector<1x8x128xf32>
    tpu.vector_store %arg4[%c0_10, %c0_11, %c0_12], %13 {strides = array<i32>} : memref<1x8x128xf32, #tpu.memory_space<vmem>>, vector<1x8x128xf32>,
    return
  }
  func.func @transform_0(%arg0: i32, %arg1: memref<8xi32, #tpu.memory_space<smem>>) -> (i32, i32) {
    %c0_i32 = arith.constant 0 : i32
    %c0_i32_0 = arith.constant 0 : i32
    return %arg0, %c0_i32 : i32, i32
  }
  func.func @transform_2(%arg0: i32, %arg1: memref<8xi32, #tpu.memory_space<smem>>) -> (i32, i32, i32) {
    %c0_i32 = arith.constant 0 : i32
    %c0_i32_0 = arith.constant 0 : i32
    %c0_i32_1 = arith.constant 0 : i32
    return %arg0, %c0_i32, %c0_i32_0 : i32, i32, i32
  }
}

</mosaic_0001>

<bundles_post_ra>
// kernel: center_loss.1
= control target key start
LH: loop header
LB: loop body
LE: loop exit
PB: predicated region body
PF: predicated region fallthrough
CT: control target
= control target key end

     0   :  { %s328_s0 = inlined_call_operand.vmem [shape: s32[8], index: 0, kind: input, shape index: {}]   ;;  %s329_s1 = inlined_call_operand.hbm [shape: f32[8,32], index: 1, kind: input, shape index: {}]   ;;  %s330_s2 = inlined_call_operand.hbm [shape: f32[10,32], index: 2, kind: input, shape index: {}]   ;;  %s331_s3 = inlined_call_operand.vmem [shape: f32[1,8,128], index: 3, kind: output, shape index: {}]  }
   0x1   :  { %s8_s14 = sshll.u32 %s328_s0, 4  ;;  %s9_s14 = int_to_ptr.vmem [resolvable:$true] %s8_s14 }
   0x2   :  { %s187_s15 = scalar_lea.vmem %s9_s14, 16  ;;  %p192_p1 = scmp.lt.s32.totalorder %s9_s14, %s9_s14 }
   0x3   :  { %p188_p0 = scmp.ne.s32.totalorder %s9_s14, %s187_s15  ;;  %p193_p2 = scmp.lt.s32.totalorder %s187_s15, %s187_s15 }
   0x5   :  { %p194_p3 = por %p193_p2, %p192_p1 }
   0x7   :  { %p195_p4 = pnand %p194_p3, %p188_p0 }
   0x9   :  { %198 = shalt.err (!%p195_p4)  }
   0xa   :  { %s267_s16 = smov [#allocation5]  }
   0xb   :  { %11 = dma.vmem_to_smem %s9_s14, 16, %s267_s16, [#allocation4] }
   0xc   :  { %253 = dma.done.wait [#allocation4], 16 }
   0xd   :  { %254 = vsyncadd [#allocation4], 4294967280 }
   0xe   :  { %13 = sfence }
   0xf   :  { %14 = vsyncpa [#allocation7], 0  ;;  %s268_s17 = smov [#allocation6]   ;;  %s199_s0 = scalar_lea.hbm %s329_s1, 128 }
  0x10   :  { %s21_s18 = sshll.u32 %s268_s17, 4  ;;  %p200_p5 = scmp.ne.s32.totalorder %s329_s1, %s199_s0  ;;  %s22_s18 = int_to_ptr.vmem [resolvable:$true] %s21_s18 }
  0x11   :  { %p203_p6 = scmp.lt.u32.totalorder %s199_s0, %s329_s1 }
  0x13   :  { %p205_p7 = pnand %p203_p6, %p200_p5 }
  0x15   :  { %208 = shalt.err (!%p205_p7)
}
  0x16   :  { %s209_s25 = scalar_lea.vmem %s22_s18, 128  ;;  %p214_p9 = scmp.lt.s32.totalorder %s22_s18, %s22_s18 }
  0x17   :  { %p210_p8 = scmp.ne.s32.totalorder %s22_s18, %s209_s25  ;;  %p215_p10 = scmp.lt.s32.totalorder %s209_s25, %s209_s25 }
  0x19   :  { %p216_p11 = por %p215_p10, %p214_p9 }
  0x1b   :  { %p217_p12 = pnand %p216_p11, %p210_p8 }
  0x1d   :  { %220 = shalt.err (!%p217_p12)
}
  0x1e   :  { %24 = dma.hbm_to_vmem [thread:$0]  %s329_s1, 128, %s22_s18, [#allocation7]  }
  0x1f   :  { %255 = dma.done.wait [#allocation7], 128  }
  0x20   :  { %256 = vsyncadd [#allocation7], 4294967168  ;;  %s305_s28 = smov 0  }
  0x21 LB: > { %s36_s29 = sld [smem:[#allocation5 + %s261_s28]]  ;;  %s39_s30 = scalar_lea.vmem [#allocation2], %s261_s28  ;;  %s261_s28 = sphi %s305_s28, %s34_s28  }
  0x22   : > { %s48_s4 = sshll.u32 %s39_s30, 4  ;;  %s40_s8 = scalar_lea.sflag [#allocation3], %s261_s28  ;;  %s49_s4 = int_to_ptr.vmem [resolvable:$true] %s48_s4 }
  0x23   : > { %s223_s12 = scalar_lea.hbm %s330_s2, 256 }
  0x27   : > { %s158_s5 = sshll.u32 %s36_s29, 4 }
  0x28   : > { %s38_s1 = scalar_lea.hbm %s330_s2, %s158_s5 }
  0x29   : > { %s221_s9 = scalar_lea.hbm %s38_s1, 16  ;;  %p224_p0 = scmp.lt.u32.totalorder %s38_s1, %s330_s2 }
  0x2a   : > { %p222_p13 = scmp.ne.s32.totalorder %s38_s1, %s221_s9  ;;  %p225_p1 = scmp.lt.u32.totalorder %s223_s12, %s221_s9 }
  0x2b   : > { %p227_p3 = scmp.lt.u32.totalorder %s221_s9, %s38_s1 }
  0x2c   : > { %p226_p2 = por %p225_p1, %p224_p0 }
  0x2e   : > { %p228_p4 = por %p227_p3, %p226_p2 }
  0x30   : > { %p229_p5 = pnand %p228_p4, %p222_p13 }
  0x32   : > { %232 = shalt.err (!%p229_p5)  }
  0x33   : > { %s233_s15 = scalar_lea.vmem %s49_s4, 16  ;;  %s269_s16 = smov [#allocation2]  }
  0x34   : > { %p234_p6 = scmp.ne.s32.totalorder %s49_s4, %s233_s15  ;;  %s235_s17 = sshll.u32 %s269_s16, 4  ;;  %s236_s17 = int_to_ptr.vmem [resolvable:$false] %s235_s17 }
  0x35   : > { %s237_s18 = scalar_lea.vmem %s236_s17, 128  ;;  %p238_p7 = scmp.lt.s32.totalorder %s49_s4, %s236_s17 }
  0x36   : > { %p239_p8 = scmp.lt.s32.totalorder %s237_s18, %s233_s15 }
  0x38   : > { %p240_p9 = por %p239_p8, %p238_p7 }
  0x3a   : > { %p241_p10 = pnand %p240_p9, %p234_p6 }
  0x3c   : > { %244 = shalt.err (!%p241_p10)  }
  0x3d   : > { %51 = dma.hbm_to_vmem [thread:$0]  %s38_s1, 16, %s49_s4, %s40_s8 }
  0x3e   : > { %s34_s28 = sadd.s32 1, %s261_s28  }
  0x3f   : > { %p31_p11 = scmp.ge.s32.totalorder %s34_s28, 8  }
  0x40   :  { %s263_s19 = smov (%p31_p11), 0  }
  0x41   :  { %33 = sbr.rel (!%p31_p11) target bundleno = 33 (0x21), region = 57 }
  0x48 LB: > { %s58_s20 = scalar_lea.sflag [#allocation3], %s265_s19  ;;  %s265_s19 = sphi %s263_s19, %s57_s19  }
  0x49   : > { %257 = dma.done.wait %s58_s20, 16 }
  0x4a   : > { %258 = vsyncadd %s58_s20, 4294967280  ;;  %s57_s19 = sadd.s32 1, %s265_s19  }
  0x4b   : > { %p54_p12 = scmp.ge.s32.totalorder %s57_s19, 8  }
  0x4c   :  { %v62_v0 = vld [vmem:[#allocation6] sm:$0xff] (%p54_p12)  ;;  %v63_v1 = vld [vmem:[#allocation2] sm:$0xff] (%p54_p12)  ;;  %vm66_vm0 = vcmask (%p54_p12), 261120   ;;  %vm70_vm1 = vcmask (%p54_p12), 7168  }
  0x4d   :  { %56 = sbr.rel (!%p54_p12) target bundleno = 72 (0x48), region = 68  ;;  %v64_v2 = vsub.f32 (%p54_p12), %v62_v0, %v63_v1 }
  0x4f   :  { %v65_v3 = vmul.f32 (%p54_p12), %v64_v2, %v64_v2 }
  0x51   :  { %v67_v4 = vsel (%p54_p12), %vm66_vm0, %v65_v3, 0.0 }
  0x52   :  { %68 = vadd.xlane.f32.xlu0 (%p54_p12), %v67_v4 }
  0xdf   :  { %v69_v5 = vpop.xlane.xlu0 %68 }
  0xe0   :  { %v71_v6 = vsel %vm70_vm1, %v69_v5, 0.0 }
  0xe1   :  { %72 = vadd.xlane.f32.xlu0 %v71_v6 }
 0x16e   :  { %v73_v7 = vpop.xlane.xlu0 %72 }
 0x16f   :  { %v74_v8 = vrot.slane %v73_v7, 4 }
 0x171   :  { %v75_v9 = vadd.f32 %v74_v8, %v73_v7 }
 0x173   :  { %v76_v10 = vrot.slane %v75_v9, 2 }
 0x175   :  { %v77_v11 = vadd.f32 %v76_v10, %v75_v9 }
 0x177   :  { %v78_v12 = vrot.slane %v77_v11, 1 }
 0x179   :  { %v79_v13 = vadd.f32 %v78_v12, %v77_v11 }
 0x17b   :  { %167 = vpush %v79_v13 }
 0x1ac   :  { %s168_s2 = spop %167 }
 0x1ad   :  { %v81_v14 = vstv %s168_s2 }
 0x1ae   :  { %82 = vst [vmem:[%s331_s3] sm:$0xff] %v81_v14 }
 0x1af   :  { %87 = vsyncpa [#allocation7], 1 }
 0x1b0   :  { %88 = vsyncmov [#allocation3] }
 0x1b3   :  { %s89_s22 = vpop.sfrf %88 }
 0x1b4   :  { %p159_p13 = scmp.ne.s32.totalorder %s89_s22, 0 }
 0x1b6   :  { %93 = shalt.err (%p159_p13)  }
 0x1b7   :  { %95 = vsyncmov [#allocation3 + $0x1] }
 0x1ba   :  { %s96_s23 = vpop.sfrf %95 }
 0x1bb   :  { %p160_p0 = scmp.ne.s32.totalorder %s96_s23, 0 }
 0x1bd   :  { %100 = shalt.err (%p160_p0)  }
 0x1be   :  { %102 = vsyncmov [#allocation3 + $0x2] }
 0x1c1   :  { %s103_s24 = vpop.sfrf %102 }
 0x1c2   :  { %p161_p1 = scmp.ne.s32.totalorder %s103_s24, 0 }
 0x1c4   :  { %107 = shalt.err (%p161_p1)  }
 0x1c5   :  { %109 = vsyncmov [#allocation3 + $0x3] }
 0x1c8   :  { %s110_s25 = vpop.sfrf %109 }
 0x1c9   :  { %p162_p2 = scmp.ne.s32.totalorder %s110_s25, 0 }
 0x1cb   :  { %114 = shalt.err (%p162_p2)  }
 0x1cc   :  { %116 = vsyncmov [#allocation3 + $0x4] }
 0x1cf   :  { %s117_s26 = vpop.sfrf %116 }
 0x1d0   :  { %p163_p3 = scmp.ne.s32.totalorder %s117_s26, 0 }
 0x1d2   :  { %121 = shalt.err (%p163_p3)  }
 0x1d3   :  { %123 = vsyncmov [#allocation3 + $0x5] }
 0x1d6   :  { %s124_s3 = vpop.sfrf %123 }
 0x1d7   :  { %p164_p4 = scmp.ne.s32.totalorder %s124_s3, 0 }
 0x1d9   :  { %128 = shalt.err (%p164_p4)  }
 0x1da   :  { %130 = vsyncmov [#allocation3 + $0x6] }
 0x1dd   :  { %s131_s27 = vpop.sfrf %130 }
 0x1de   :  { %p165_p5 = scmp.ne.s32.totalorder %s131_s27, 0 }
 0x1e0   :  { %135 = shalt.err (%p165_p5)  }
 0x1e1   :  { %137 = vsyncmov [#allocation3 + $0x7] }
 0x1e4   :  { %s138_s28 = vpop.sfrf %137 }
 0x1e5   :  { %p166_p6 = scmp.ne.s32.totalorder %s138_s28, 0 }
 0x1e7   :  { %142 = shalt.err (%p166_p6)  }

</bundles_post_ra>
